<compile_context>
chip_gen: v5e
topology: v5e:2x2
jax: 0.10.0
libtpu: 0.0.40
codegen_flags: <defaults>
</compile_context>

<pallas_src>
import functools

import jax
import jax.numpy as jnp
from jax.experimental import pallas as pl
from jax.experimental.pallas import tpu as pltpu

_ELEMS = 20 * 20          # 400 elements per instance
_LANES = 128
_PADDED = 512             # 400 padded up to a multiple of 128 (lane-dense)
_SUBLANES = 8
_MAX_BLOCK_ROWS = 2048    # 2048 * 512 * 4 B = 4 MiB per buffer -> safely in VMEM


def _int_pow(x, n):
    """x**n for static integer n >= 1, unrolled at trace time (exp-by-squaring)."""
    result = None
    base = x
    while n > 0:
        if n & 1:
            result = base if result is None else result * base
        n >>= 1
        if n:
            base = base * base
    return result


def _ddp_comm_hook_kernel(x_ref, pc_ref, o_ref, *, n_pow):
    # x_ref: f32[bblk, 512] VMEM tile, pc_ref: f32[1, 512] (broadcast over rows).
    xp = _int_pow(x_ref[...], n_pow)
    o_ref[...] = pc_ref[...] * xp


def _pick_batch_block(b_pad):
    """b_pad is a multiple of 8; return a row-block size dividing it."""
    if b_pad <= _MAX_BLOCK_ROWS:
        return b_pad                      # single grid step, one dense block
    for cand in (2048, 1024, 512, 256, 128, 64, 32, 16, 8):
        if b_pad % cand == 0:
            return cand
    return 8  # unreachable: b_pad is always a multiple of 8


@functools.partial(jax.jit, static_argnums=(1,))
def ddp_comm_hook_forward(x, rank, p0, p1):
    """Forward of TestDdpCommHook.

    x:    f32[20,20] or f32[B,20,20]
    rank: static Python int >= 0
    p0/p1: f32[20,20] parameters of the two Task sub-modules.
    """
    if rank < 0:
        raise ValueError("rank must be >= 0")

    single = (x.ndim == 2)
    xb = x[None] if single else x                        # (B, 20, 20)
    B = xb.shape[0]

    # Fold the two parameter multiplies: p0*xp + p1*(10*xp) == (p0 + 10*p1)*xp.
    pc = (p0 + 10.0 * p1).astype(jnp.float32).reshape(1, _ELEMS)
    pc = jnp.pad(pc, ((0, 0), (0, _PADDED - _ELEMS)))    # (1, 512) lane-dense

    # Lane-dense (pad 400 -> 512) and sublane-dense (pad B -> multiple of 8).
    b_pad = -(-B // _SUBLANES) * _SUBLANES
    xf = xb.astype(jnp.float32).reshape(B, _ELEMS)
    xf = jnp.pad(xf, ((0, b_pad - B), (0, _PADDED - _ELEMS)))   # (b_pad, 512)

    bblk = _pick_batch_block(b_pad)
    grid = (b_pad // bblk,)

    kernel = functools.partial(_ddp_comm_hook_kernel, n_pow=rank + 1)

    out_flat = pl.pallas_call(
        kernel,
        out_shape=jax.ShapeDtypeStruct((b_pad, _PADDED), jnp.float32),
        grid=grid,
        in_specs=[
            pl.BlockSpec((bblk, _PADDED), lambda i: (i, 0)),   # x row tiles
            pl.BlockSpec((1, _PADDED), lambda i: (0, 0)),      # folded params (resident)
        ],
        out_specs=pl.BlockSpec((bblk, _PADDED), lambda i: (i, 0)),
        compiler_params=pltpu.CompilerParams(
            dimension_semantics=("parallel",)),   # independent row tiles
    )(xf, pc)

    out = out_flat[:B, :_ELEMS].reshape(B, 20, 20)
    return out[0] if single else out


if __name__ == "__main__":
    key = jax.random.PRNGKey(0)
    k_p0, k_p1, k_x, k_xb = jax.random.split(key, 4)

    # Parameters of the two Task sub-modules (module uses randn(20, 20) each).
    p0 = jax.random.normal(k_p0, (20, 20), dtype=jnp.float32)
    p1 = jax.random.normal(k_p1, (20, 20), dtype=jnp.float32)

    rank = 1  # e.g. process rank 1 -> exponent 2 (static / specialized)

    def reference(x):
        xp = x ** (1 + rank)
        return p0 * xp + p1 * (10.0 * xp)

    # ---- single (20, 20) instance, matching the module's forward signature ----
    x = jax.random.normal(k_x, (20, 20), dtype=jnp.float32)
    out = jax.block_until_ready(ddp_comm_hook_forward(x, rank, p0, p1))
    assert out.shape == (20, 20)
    assert jnp.allclose(out, reference(x), rtol=1e-5, atol=1e-4), "single mismatch"

    # ---- batched: 16 instances in ONE lane/sublane-dense pallas_call ----
    xs = jax.random.normal(k_xb, (16, 20, 20), dtype=jnp.float32)
    outs = jax.block_until_ready(ddp_comm_hook_forward(xs, rank, p0, p1))
    assert outs.shape == (16, 20, 20)
    assert jnp.allclose(outs, reference(xs), rtol=1e-5, atol=1e-4), "batched mismatch"

    # ---- rank 0 path (exponent 1) ----
    out0 = jax.block_until_ready(ddp_comm_hook_forward(x, 0, p0, p1))
    assert jnp.allclose(out0, p0 * x + p1 * (10.0 * x), rtol=1e-5, atol=1e-4), "rank0 mismatch"

    print("KERNEL_OK")
</pallas_src>

<mosaic_0001>
module attributes {stable_mosaic.version = 11 : i64} {
  func.func @_ddp_comm_hook_kernel(%arg0: i32, %arg1: memref<8x512xf32, #tpu.memory_space<vmem>>, %arg2: memref<1x512xf32, #tpu.memory_space<vmem>>, %arg3: memref<8x512xf32, #tpu.memory_space<vmem>>) attributes {dimension_semantics = [#tpu.dimension_semantics<parallel>], iteration_bounds = array<i64: 1>, scalar_prefetch = 0 : i64, scratch_operands = 0 : i64, tpu.core_type = #tpu.core_type<tc>, window_params = [{transform_indices = @transform_0, window_bounds = array<i64: 8, 512>}, {pipeline_mode = #tpu.pipeline_mode<synchronous>, transform_indices = @transform_1, window_bounds = array<i64: 1, 512>}, {transform_indices = @transform_2, window_bounds = array<i64: 8, 512>}]} {
    %c0 = arith.constant 0 : index
    %c0_0 = arith.constant 0 : index
    %0 = vector.load %arg1[%c0, %c0_0] : memref<8x512xf32, #tpu.memory_space<vmem>>, vector<8x512xf32>
    %1 = arith.mulf %0, %0 : vector<8x512xf32>
    %c0_1 = arith.constant 0 : index
    %c0_2 = arith.constant 0 : index
    %2 = vector.load %arg2[%c0_1, %c0_2] : memref<1x512xf32, #tpu.memory_space<vmem>>, vector<1x512xf32>
    %3 = vector.broadcast %2 : vector<1x512xf32> to vector<8x512xf32>
    %4 = arith.mulf %3, %1 : vector<8x512xf32>
    %c0_3 = arith.constant 0 : index
    %c0_4 = arith.constant 0 : index
    %5 = vector.load %arg3[%c0_3, %c0_4] : memref<8x512xf32, #tpu.memory_space<vmem>>, vector<8x512xf32>
    tpu.vector_store %arg3[%c0_3, %c0_4], %4 {strides = array<i32>} : memref<8x512xf32, #tpu.memory_space<vmem>>, vector<8x512xf32>,
    return
  }
  func.func @transform_0(%arg0: i32) -> (i32, i32) {
    %c0_i32 = arith.constant 0 : i32
    %c0_i32_0 = arith.constant 0 : i32
    return %arg0, %c0_i32 : i32, i32
  }
  func.func @transform_1(%arg0: i32) -> (i32, i32) {
    %c0_i32 = arith.constant 0 : i32
    %c0_i32_0 = arith.constant 0 : i32
    %c0_i32_1 = arith.constant 0 : i32
    return %c0_i32, %c0_i32_0 : i32, i32
  }
  func.func @transform_2(%arg0: i32) -> (i32, i32) {
    %c0_i32 = arith.constant 0 : i32
    %c0_i32_0 = arith.constant 0 : i32
    return %arg0, %c0_i32 : i32, i32
  }
}

</mosaic_0001>

<bundles_post_ra>
// kernel: ddp_comm_hook_forward.1
= control target key start
LH: loop header
LB: loop body
LE: loop exit
PB: predicated region body
PF: predicated region fallthrough
CT: control target
= control target key end

     0   :  { %s83_s0 = inlined_call_operand.vmem [shape: f32[8,512], index: 0, kind: input, shape index: {}]   ;;  %s84_s1 = inlined_call_operand.vmem [shape: f32[1,512], index: 1, kind: input, shape index: {}]   ;;  %s85_s2 = inlined_call_operand.vmem [shape: f32[8,512], index: 2, kind: output, shape index: {}]  }
   0x1   :  { %v11_v0 = vld [vmem:[%s83_s0] sm:$0xff]  ;;  %v12_v2 = vld [vmem:[%s83_s0 + $0x8] sm:$0xff]  ;;  %v13_v7 = vld [vmem:[%s83_s0 + $0x10] sm:$0xff] }
   0x2   :  { %v19_v1 = vld [vmem:[%s84_s1] sm:$0xf]  ;;  %v15_v3 = vmul.f32 %v11_v0, %v11_v0  ;;  %v16_v5 = vmul.f32 %v12_v2, %v12_v2  ;;  %v14_v8 = vld [vmem:[%s83_s0 + $0x18] sm:$0xff]  ;;  %v17_v9 = vmul.f32 %v13_v7, %v13_v7 }
   0x3   :  { %v21_v4 = vperm.slane %v19_v1, 0  ;;  %v22_v6 = vperm.slane %v19_v1, 1  ;;  %v23_v10 = vperm.slane %v19_v1, 2  ;;  %v18_v11 = vmul.f32 %v14_v8, %v14_v8 }
   0x4   :  { %v24_v12 = vperm.slane %v19_v1, 3 }
   0x5   :  { %v29_v13 = vmul.f32 %v21_v4, %v15_v3  ;;  %v30_v14 = vmul.f32 %v22_v6, %v16_v5  ;;  %v31_v15 = vmul.f32 %v23_v10, %v17_v9 }
   0x6   :  { %v32_v16 = vmul.f32 %v24_v12, %v18_v11 }
   0x7   :  { %33 = vst [vmem:[%s85_s2] sm:$0xff] %v29_v13 }
   0x8   :  { %34 = vst [vmem:[%s85_s2 + $0x8] sm:$0xff] %v30_v14 }
   0x9   :  { %35 = vst [vmem:[%s85_s2 + $0x10] sm:$0xff] %v31_v15 }
   0xa   :  { %36 = vst [vmem:[%s85_s2 + $0x18] sm:$0xff] %v32_v16 }

</bundles_post_ra>
